<compile_context>
chip_gen: v7x
topology: tpu7x:2x2x1
jax: 0.10.0
libtpu: 0.0.40
codegen_flags: <defaults>
</compile_context>

<pallas_src>
import jax
import jax.numpy as jnp
from jax.experimental import pallas as pl
from jax.experimental.pallas import tpu as pltpu

BN_EPS = 1e-5
_SUBLANE = 8  # f32 sublane tile; channel counts are padded to this.


def _round_up(x, m):
    return (x + m - 1) // m * m


# -----------------------------------------------------------------------------
# pltpu.roll direction calibration.
# We need  shifted[j] = x[j + d]  for a static pixel offset d.  With jnp.roll
# semantics (result[i] = x[i - shift]) the shift is (-d) mod lanes.  A tiny
# one-off probe kernel pins the convention down so the conv taps can never be
# silently mirrored.
# -----------------------------------------------------------------------------
_ROLL_SIGN = None


def _roll_sign():
    global _ROLL_SIGN
    if _ROLL_SIGN is not None:
        return _ROLL_SIGN

    def probe(x_ref, o_ref):
        o_ref[...] = pltpu.roll(x_ref[...], shift=1, axis=1)

    x = (jnp.arange(8 * 128, dtype=jnp.float32) + 1.0).reshape(8, 128)
    y = pl.pallas_call(
        probe, out_shape=jax.ShapeDtypeStruct((8, 128), jnp.float32))(x)
    # jnp.roll convention: y[0, 1] == x[0, 0] == 1.0
    _ROLL_SIGN = -1 if abs(float(y[0, 1]) - 1.0) < 0.5 else 1
    return _ROLL_SIGN


# -----------------------------------------------------------------------------
# Fused kernel: conv+BN+ReLU stack, 1x1 head, tanh, residual add, clamp.
# Activations never leave VMEM/registers between layers.
# -----------------------------------------------------------------------------
def _make_kernel(kernel_sizes, H, W, roll_sign):
    n_layers = len(kernel_sizes)

    def kernel(*refs):
        x_ref, last_ref = refs[0], refs[1]
        layer_refs = refs[2:2 + 2 * n_layers]
        hw_ref = refs[2 + 2 * n_layers]
        hb_ref = refs[3 + 2 * n_layers]
        o_ref = refs[4 + 2 * n_layers]

        x = x_ref[...]                                   # (Cin_p, lanes) f32
        lanes = x.shape[-1]

        # Output-pixel coordinates per lane (batch is folded onto lanes in
        # whole-image chunks, so j % (H*W) is the in-image pixel index).
        lane = jax.lax.broadcasted_iota(jnp.int32, (1, lanes), 1)
        col = lane % W
        row = (lane // W) % H

        mask_cache = {}  # (oy, ox) -> f32 (1, lanes) boundary mask

        def boundary_mask(oy, ox):
            key = (oy, ox)
            if key not in mask_cache:
                valid = ((row + oy >= 0) & (row + oy < H) &
                         (col + ox >= 0) & (col + ox < W))
                mask_cache[key] = valid.astype(jnp.float32)
            return mask_cache[key]

        for li, k in enumerate(kernel_sizes):
            w_ref = layer_refs[2 * li]                   # (Cout_p, k*k*Cin_p)
            sh_ref = layer_refs[2 * li + 1]              # (Cout_p, 1)
            p = k // 2

            # In-register im2col: k*k rolled + boundary-masked copies of x,
            # stacked along the (8-aligned) channel axis.
            pieces = []
            for dy in range(k):
                for dx in range(k):
                    oy, ox = dy - p, dx - p
                    if oy == 0 and ox == 0:
                        pieces.append(x)                 # center tap: as-is
                        continue
                    d = oy * W + ox                      # flat pixel offset
                    shift = (roll_sign * d) % lanes      # static, non-negative
                    shifted = pltpu.roll(x, shift=shift, axis=1)
                    pieces.append(shifted * boundary_mask(oy, ox))
            xc = jnp.concatenate(pieces, axis=0)         # (k*k*Cin_p, lanes)

            # One deep-K MXU matmul per layer; BN scale already folded into w.
            z = jnp.dot(w_ref[...], xc, preferred_element_type=jnp.float32)
            x = jnp.maximum(z + sh_ref[...], 0.0)        # bias/BN shift + ReLU

        # 1x1 conv head + tanh residual + clamp to [0, 1].
        r = jnp.dot(hw_ref[...], x, preferred_element_type=jnp.float32)
        r = jnp.tanh(r + hb_ref[...])
        o_ref[...] = jnp.clip(last_ref[...] + r, 0.0, 1.0).astype(o_ref.dtype)

    return kernel


# -----------------------------------------------------------------------------
# Wrapper: layout plumbing (reshape/transpose/pad) in XLA, everything else in
# one pallas_call.
# -----------------------------------------------------------------------------
def residule_conv_v1_forward(minimaps, params, history_len, in_layers, out_layers):
    B, T, L, H, W = minimaps.shape
    N = H * W
    Lin, Lout = len(in_layers), len(out_layers)
    in_idx = jnp.asarray(in_layers)
    out_idx = jnp.asarray(out_layers)
    cin0 = history_len * Lin
    cin0p = params["in_ch0_pad"]

    # Fold batch onto the lane axis (batch-major): x is (C, B*N).
    x0 = minimaps[:, :history_len, in_idx].reshape(B, cin0, N)
    x0 = jnp.transpose(x0, (1, 0, 2)).reshape(cin0, B * N)
    x0 = jnp.pad(x0, ((0, cin0p - cin0), (0, 0)))        # sublane-align channels
    last = minimaps[:, history_len - 1, out_idx].reshape(B, Lout, N)
    last = jnp.transpose(last, (1, 0, 2)).reshape(Lout, B * N)

    kernel_sizes = [k for (_, _, k) in params["layers"]]
    kernel = _make_kernel(kernel_sizes, H, W, _roll_sign())

    # 2-way "parallel" lane split only when the batch divides cleanly into two
    # lane-dense halves (both v7x TensorCores get work); else a single step.
    total = B * N
    lane_blocks = 2 if (B % 2 == 0 and (total // 2) % 128 == 0) else 1
    LB = total // lane_blocks

    inputs = [x0, last]
    in_specs = [
        pl.BlockSpec((cin0p, LB), lambda i: (0, i)),
        pl.BlockSpec((Lout, LB), lambda i: (0, i)),
    ]
    flops = 0
    for (w2, sh, k) in params["layers"]:
        inputs += [w2, sh]
        in_specs += [
            pl.BlockSpec(w2.shape, lambda i: (0, 0)),
            pl.BlockSpec(sh.shape, lambda i: (0, 0)),
        ]
        flops += 2 * w2.shape[0] * w2.shape[1] * total
    inputs += [params["head_w"], params["head_b"]]
    in_specs += [
        pl.BlockSpec(params["head_w"].shape, lambda i: (0, 0)),
        pl.BlockSpec(params["head_b"].shape, lambda i: (0, 0)),
    ]
    flops += 2 * params["head_w"].shape[0] * params["head_w"].shape[1] * total

    bytes_accessed = sum(int(a.size) * a.dtype.itemsize for a in inputs)
    bytes_accessed += Lout * total * 4
    cost = pl.CostEstimate(flops=int(flops),
                           transcendentals=int(Lout * total),
                           bytes_accessed=int(bytes_accessed))

    out = pl.pallas_call(
        kernel,
        out_shape=jax.ShapeDtypeStruct((Lout, total), jnp.float32),
        grid=(lane_blocks,),
        in_specs=in_specs,
        out_specs=pl.BlockSpec((Lout, LB), lambda i: (0, i)),
        compiler_params=pltpu.CompilerParams(
            dimension_semantics=("parallel",)),
        cost_estimate=cost,
    )(*inputs)

    out = out.reshape(Lout, B, N).transpose(1, 0, 2).reshape(B, Lout, H, W)
    return out[:, None]                                  # [B, 1, Lout, H, W]


# -----------------------------------------------------------------------------
# Deterministic parameter construction (matches nn.Conv2d / nn.BatchNorm2d).
# Kernel-side layout: BN scale folded into weights, im2col column order
# (tap-major, channel-minor), channels padded to the 8-row sublane tile.
# -----------------------------------------------------------------------------
def init_params(key, history_len, n_in_layers, n_out_layers, hidden_chs, kernel_sizes):
    assert len(hidden_chs) == len(kernel_sizes)
    params = {"layers": [], "torch": []}
    in_ch = history_len * n_in_layers
    in_ch_p = _round_up(in_ch, _SUBLANE)
    params["in_ch0_pad"] = in_ch_p

    for out_ch, k in zip(hidden_chs, kernel_sizes):
        key, kw, kb, kg, kbe, km, kv = jax.random.split(key, 7)
        fan_in = in_ch * k * k
        bound = float(fan_in) ** -0.5
        Wt = jax.random.uniform(kw, (out_ch, in_ch, k, k), jnp.float32, -bound, bound)
        bias = jax.random.uniform(kb, (out_ch,), jnp.float32, -bound, bound)
        gamma = jax.random.uniform(kg, (out_ch,), jnp.float32, 0.5, 1.5)
        beta = jax.random.uniform(kbe, (out_ch,), jnp.float32, -0.1, 0.1)
        mean = jax.random.uniform(km, (out_ch,), jnp.float32, -0.1, 0.1)
        var = jax.random.uniform(kv, (out_ch,), jnp.float32, 0.5, 1.5)

        # Eval-mode BN folded: y = (conv + bias - mean)*scale + beta
        scale = gamma / jnp.sqrt(var + BN_EPS)
        shift = (bias - mean) * scale + beta
        out_ch_p = _round_up(out_ch, _SUBLANE)

        wf = Wt * scale[:, None, None, None]             # fold scale into conv
        # [Cout, Cin, k, k] -> [Cout, k*k, Cin] (tap-major) -> pad -> flatten.
        w2 = jnp.transpose(wf, (0, 2, 3, 1)).reshape(out_ch, k * k, in_ch)
        w2 = jnp.pad(w2, ((0, out_ch_p - out_ch), (0, 0), (0, in_ch_p - in_ch)))
        w2 = w2.reshape(out_ch_p, k * k * in_ch_p)
        sh = jnp.pad(shift, (0, out_ch_p - out_ch)).reshape(out_ch_p, 1)

        params["layers"].append((w2, sh, k))
        params["torch"].append((Wt, bias, gamma, beta, mean, var, k))
        in_ch, in_ch_p = out_ch, out_ch_p

    key, kw, kb = jax.random.split(key, 3)
    bound = float(in_ch) ** -0.5
    Wh = jax.random.uniform(kw, (n_out_layers, in_ch, 1, 1), jnp.float32, -bound, bound)
    bh = jax.random.uniform(kb, (n_out_layers,), jnp.float32, -bound, bound)
    params["head_w"] = jnp.pad(Wh[:, :, 0, 0], ((0, 0), (0, in_ch_p - in_ch)))
    params["head_b"] = bh.reshape(n_out_layers, 1)
    params["torch_head"] = (Wh, bh)
    return params


# -----------------------------------------------------------------------------
# Pure-JAX reference (lax.conv, f32 HIGHEST) for correctness checking.
# -----------------------------------------------------------------------------
def reference_forward(minimaps, params, history_len, in_layers, out_layers):
    B, T, L, H, W = minimaps.shape
    x = minimaps[:, :history_len, jnp.asarray(in_layers)].reshape(
        B, history_len * len(in_layers), H, W)
    dn = ("NCHW", "OIHW", "NCHW")
    for (Wt, bias, gamma, beta, mean, var, k) in params["torch"]:
        x = jax.lax.conv_general_dilated(x, Wt, (1, 1), "SAME",
                                         dimension_numbers=dn,
                                         precision=jax.lax.Precision.HIGHEST)
        x = (x + bias[None, :, None, None] - mean[None, :, None, None]) \
            / jnp.sqrt(var[None, :, None, None] + BN_EPS) \
            * gamma[None, :, None, None] + beta[None, :, None, None]
        x = jnp.maximum(x, 0.0)
    Wh, bh = params["torch_head"]
    x = jax.lax.conv_general_dilated(x, Wh, (1, 1), "SAME",
                                     dimension_numbers=dn,
                                     precision=jax.lax.Precision.HIGHEST)
    x = jnp.tanh(x + bh[None, :, None, None])
    last = minimaps[:, history_len - 1, jnp.asarray(out_layers)]
    return jnp.clip(last + x, 0.0, 1.0)[:, None]


if __name__ == "__main__":
    # Small synthetic config consistent with ResiduleConvV1:
    #   history_len=3, 4 named minimap layers, in/out layer indices [0, 1],
    #   hidden_chs=[8, 8], kernel_sizes=[3, 3]  -> first conv in_ch = 3*2 = 6.
    B, T, L, H, W = 2, 4, 4, 16, 16
    history_len = 3
    in_layers = [0, 1]
    out_layers = [0, 1]
    hidden_chs = [8, 8]
    kernel_sizes = [3, 3]

    key = jax.random.PRNGKey(0)
    k_data, k_params = jax.random.split(key)
    minimaps = jax.random.uniform(k_data, (B, T, L, H, W), jnp.float32)
    params = init_params(k_params, history_len, len(in_layers), len(out_layers),
                         hidden_chs, kernel_sizes)

    pred = residule_conv_v1_forward(minimaps, params, history_len, in_layers, out_layers)
    pred = jax.block_until_ready(pred)
    assert pred.shape == (B, 1, len(out_layers), H, W), pred.shape

    ref = jax.block_until_ready(
        reference_forward(minimaps, params, history_len, in_layers, out_layers))
    max_err = float(jnp.max(jnp.abs(pred - ref)))
    # All-f32 operands; loose bound still covers any bf16-pass MXU rounding.
    assert max_err < 5e-2, f"max abs err {max_err}"
    print("KERNEL_OK")
</pallas_src>

<mosaic_0001>
module attributes {stable_mosaic.version = 11 : i64} {
  func.func @probe(%arg0: memref<8x128xf32, #tpu.memory_space<vmem>>, %arg1: memref<8x128xf32, #tpu.memory_space<vmem>>) attributes {dimension_semantics = [], scalar_prefetch = 0 : i64, scratch_operands = 0 : i64, tpu.core_type = #tpu.core_type<tc>} {
    %c0 = arith.constant 0 : index
    %c0_0 = arith.constant 0 : index
    %0 = vector.load %arg0[%c0, %c0_0] : memref<8x128xf32, #tpu.memory_space<vmem>>, vector<8x128xf32>
    %c1_i32 = arith.constant 1 : i32
    %1 = tpu.dynamic_rotate %0 by %c1_i32 dim 1 : vector<8x128xf32>, i32 -> vector<8x128xf32>
    %c0_1 = arith.constant 0 : index
    %c0_2 = arith.constant 0 : index
    %2 = vector.load %arg1[%c0_1, %c0_2] : memref<8x128xf32, #tpu.memory_space<vmem>>, vector<8x128xf32>
    tpu.vector_store %arg1[%c0_1, %c0_2], %1 {strides = array<i32>} : memref<8x128xf32, #tpu.memory_space<vmem>>, vector<8x128xf32>,
    return
  }
}

</mosaic_0001>

<bundles_post_ra>
// kernel: tpu_custom_call.1
= control target key start
LH: loop header
LB: loop body
LE: loop exit
PB: predicated region body
PF: predicated region fallthrough
CT: control target
= control target key end

     0   :  { %6 = vsyncpa [#allocation3], 0  ;;  %s128_s0 = inlined_call_operand.hbm [shape: f32[8,128], index: 0, kind: input, shape index: {}]   ;;  %s129_s1 = inlined_call_operand.hbm [shape: f32[8,128], index: 1, kind: output, shape index: {}]  }
   0x1   :  { %7 = vsyncpa [#allocation4], 0  ;;  %s91_s6 = smov [#allocation2]   ;;  %s43_s10 = scalar_lea.hbm %s128_s0, 128 }
   0x2   :  { %s14_s7 = sshll.u32 %s91_s6, 4  ;;  %p44_p0 = scmp.ne.s32.totalorder %s128_s0, %s43_s10  ;;  %s15_s7 = int_to_ptr.vmem [resolvable:$true] %s14_s7 }
   0x3   :  { %p47_p1 = scmp.lt.u32.totalorder %s43_s10, %s128_s0 }
   0x5   :  { %p49_p2 = pnand %p47_p1, %p44_p0 }
   0x7   :  { %52 = shalt.err (!%p49_p2)
}
   0x8   :  { %s53_s15 = scalar_lea.vmem %s15_s7, 128  ;;  %p58_p4 = scmp.lt.s32.totalorder %s15_s7, %s15_s7 }
   0x9   :  { %p54_p3 = scmp.ne.s32.totalorder %s15_s7, %s53_s15  ;;  %p59_p5 = scmp.lt.s32.totalorder %s53_s15, %s53_s15 }
   0xb   :  { %p60_p6 = por %p59_p5, %p58_p4 }
   0xd   :  { %p61_p7 = pnand %p60_p6, %p54_p3 }
   0xf   :  { %64 = shalt.err (!%p61_p7)
}
  0x10   :  { %17 = dma.hbm_to_vmem [thread:$0]  %s128_s0, 128, %s15_s7, [#allocation3]  }
  0x11   :  { %87 = dma.done.wait [#allocation3], 128  }
  0x12   :  { %88 = vsyncadd [#allocation3], 4294967168  ;;  %v21_v0 = vld [vmem:[#allocation2] sm:$0xff]  ;;  %s92_s18 = smov 1   ;;  %s93_s19 = smov [#allocation5]  }
  0x13   :  { %22 = vrot.lane.b32.xlu0 %v21_v0, %s92_s18  ;;  %s31_s20 = sshll.u32 %s93_s19, 4  ;;  %s32_s20 = int_to_ptr.vmem [resolvable:$true] %s31_s20 }
  0x14   :  { %s65_s21 = scalar_lea.vmem %s32_s20, 128  ;;  %p70_p9 = scmp.lt.s32.totalorder %s32_s20, %s32_s20 }
  0x15   :  { %p66_p8 = scmp.ne.s32.totalorder %s32_s20, %s65_s21  ;;  %p71_p10 = scmp.lt.s32.totalorder %s65_s21, %s65_s21 }
  0x17   :  { %p72_p11 = por %p71_p10, %p70_p9 }
  0x19   :  { %p73_p12 = pnand %p72_p11, %p66_p8 }
  0x85   :  { %v23_v1 = vpop.permute.xlu0 %22 }
  0x86   :  { %24 = vst [vmem:[#allocation5] sm:$0xff] %v23_v1 }
  0x87   :  { %76 = shalt.err (!%p73_p12)
}
  0x88   :  { %s77_s0 = scalar_lea.hbm %s129_s1, 128 }
  0x89   :  { %p78_p13 = scmp.ne.s32.totalorder %s129_s1, %s77_s0  ;;  %p81_p0 = scmp.lt.u32.totalorder %s77_s0, %s129_s1 }
  0x8b   :  { %p83_p1 = pnand %p81_p0, %p78_p13 }
  0x8d   :  { %86 = shalt.err (!%p83_p1)
}
  0x8e   :  { %34 = dma.vmem_to_hbm [thread:$0]  %s32_s20, 128, %s129_s1, [#allocation4]  }
  0x8f   :  { %89 = dma.done.wait [#allocation4], 128  }
  0x90   :  { %90 = vsyncadd [#allocation4], 4294967168 }
  0x91   :  { %38 = vsyncpa [#allocation3], 1 }
  0x92   :  { %39 = vsyncpa [#allocation4], 1 }

</bundles_post_ra>
